<compile_context>
chip_gen: v7x
topology: tpu7x:2x2x1
jax: 0.10.0
libtpu: 0.0.40
codegen_flags: <defaults>
</compile_context>

<pallas_src>
import functools

import jax
import jax.numpy as jnp
from jax.experimental import pallas as pl
from jax.experimental.pallas import tpu as pltpu

_EPS = 1e-5
INP_DIM = 28 * 28          # 784
MID_DIM = 64
OUT_DIM = 10


# ----------------------------- fused Pallas kernel ---------------------------

def dense1d_kernel(x_ref,
                   w00_ref, b00_ref,
                   w10_ref, b10_ref,
                   w11_ref, b11_ref,
                   w20_ref, b20_ref,
                   w21_ref, b21_ref,
                   w30_ref, b30_ref,
                   wout_ref,
                   o_ref):
    """Whole Dense1dNet forward for one batch tile; everything stays in VMEM.

    Each `block` is: Linear (spectral-normalized weight, BN1d scale/shift
    folded into W and b at init time) -> ReLU.
    """

    def block(h, w_ref, b_ref):
        y = jnp.dot(h, w_ref[...], preferred_element_type=jnp.float32) + b_ref[...]
        return jnp.maximum(y, 0.0)

    x00 = x_ref[...]                                       # (TB, 784)
    x10 = block(x00, w00_ref, b00_ref)                     # (TB, 64)
    x11 = block(x10, w10_ref, b10_ref)                     # (TB, 64)
    x11 = block(x11, w11_ref, b11_ref) + x10               # residual
    x20 = jnp.concatenate((x10, x11), axis=1)              # (TB, 128)
    x21 = block(x20, w20_ref, b20_ref)                     # (TB, 128)
    x21 = block(x21, w21_ref, b21_ref) + x20               # residual
    x30 = jnp.concatenate((x20, x21), axis=1)              # (TB, 256)
    x30 = block(x30, w30_ref, b30_ref)                     # (TB, 256)

    # TODO(synk): nn.Dropout with a per-forward random p (rd.uniform(0.125, 0.375))
    # has no deterministic equivalent; implemented as identity (eval semantics).
    logits = jnp.dot(x30, wout_ref[...],
                     preferred_element_type=jnp.float32)   # (TB, 10)

    # numerically stable LogSoftmax(dim=1)
    m = jnp.max(logits, axis=1, keepdims=True)
    lse = m + jnp.log(jnp.sum(jnp.exp(logits - m), axis=1, keepdims=True))
    o_ref[...] = logits - lse


# ------------------------------ pallas_call glue ------------------------------

@jax.jit
def dense1d_forward(x, params):
    """x: any shape flattening to (N, 784) (e.g. NCHW MNIST). Returns (N, 10)."""
    n = x.shape[0]
    x2 = x.reshape(n, -1).astype(jnp.float32)              # NnnReshape((-1, 784))

    # batch tile: multiple of 8 sublanes; grid is "parallel" so larger batches
    # shard across TensorCores (v7x).  At n=2 this is a single program.
    tb = min(128, 8 * pl.cdiv(n, 8))
    n_pad = tb * pl.cdiv(n, tb)
    if n_pad != n:
        x2 = jnp.pad(x2, ((0, n_pad - n), (0, 0)))

    weights = [params[k] for k in ("w00", "b00", "w10", "b10", "w11", "b11",
                                   "w20", "b20", "w21", "b21", "w30", "b30",
                                   "wout")]

    in_specs = [pl.BlockSpec((tb, INP_DIM), lambda i: (i, 0))]
    in_specs += [pl.BlockSpec(w.shape, lambda i: (0, 0)) for w in weights]

    out = pl.pallas_call(
        dense1d_kernel,
        out_shape=jax.ShapeDtypeStruct((n_pad, OUT_DIM), jnp.float32),
        grid=(n_pad // tb,),
        in_specs=in_specs,
        out_specs=pl.BlockSpec((tb, OUT_DIM), lambda i: (i, 0)),
        compiler_params=pltpu.CompilerParams(
            dimension_semantics=("parallel",)),
    )(x2, *weights)
    return out[:n]


# ------------------------------ parameter prep --------------------------------

def _spectral_normalize(key, w_pt, n_iters=2, eps=1e-12):
    """Power-iteration spectral norm (PyTorch semantics), applied at init time."""
    u = jax.random.normal(key, (w_pt.shape[0],), jnp.float32)
    u = u / (jnp.linalg.norm(u) + eps)
    v = None
    for _ in range(n_iters):
        v = w_pt.T @ u
        v = v / (jnp.linalg.norm(v) + eps)
        u = w_pt @ v
        u = u / (jnp.linalg.norm(u) + eps)
    sigma = u @ (w_pt @ v)
    return w_pt / sigma


def _fold_bn(w_io, b, gamma, beta, mean, var):
    """Fold inference-mode BatchNorm1d into the preceding Linear: y = x@W' + b'."""
    s = gamma / jnp.sqrt(var + _EPS)
    t = beta - mean * s
    w_f = (w_io * s[None, :]).astype(jnp.float32)
    b_f = (b * s + t) if b is not None else t
    return w_f, b_f.reshape(1, -1).astype(jnp.float32)


def init_params(key):
    ks = iter(jax.random.split(key, 64))

    def linear(in_dim, out_dim, bias):
        w_pt = (in_dim ** -0.5) * jax.random.normal(next(ks), (out_dim, in_dim),
                                                    jnp.float32)
        w_pt = _spectral_normalize(next(ks), w_pt, n_iters=2)
        b = (0.1 * jax.random.normal(next(ks), (out_dim,), jnp.float32)) if bias else None
        return w_pt.T, b                                   # (in, out)

    def bn(c):
        gamma = 1.0 + 0.1 * jax.random.normal(next(ks), (c,), jnp.float32)
        beta = 0.1 * jax.random.normal(next(ks), (c,), jnp.float32)
        mean = 0.1 * jax.random.normal(next(ks), (c,), jnp.float32)
        var = 0.5 + jax.random.uniform(next(ks), (c,), jnp.float32)
        return gamma, beta, mean, var

    layers = {
        "00": (INP_DIM, MID_DIM, True),       # dense00: 784 -> 64, bias
        "10": (MID_DIM, MID_DIM, False),      # dense10: 64 -> 64
        "11": (MID_DIM, MID_DIM, False),      # dense11: 64 -> 64
        "20": (2 * MID_DIM, 2 * MID_DIM, False),   # dense20: 128 -> 128
        "21": (2 * MID_DIM, 2 * MID_DIM, False),   # dense21: 128 -> 128
        "30": (4 * MID_DIM, 4 * MID_DIM, True),    # dense30: 256 -> 256, bias
    }
    # TODO(synk): BatchNorm1d implemented with inference-mode running stats
    # (folded scale/shift), not training-mode batch statistics.
    p = {}
    for name, (din, dout, bias) in layers.items():
        w_io, b = linear(din, dout, bias)
        gamma, beta, mean, var = bn(dout)
        p["w" + name], p["b" + name] = _fold_bn(w_io, b, gamma, beta, mean, var)

    # dense_out classifier: plain Linear(256, 10, bias=False) (no spectral norm / BN)
    w_pt = ((4 * MID_DIM) ** -0.5) * jax.random.normal(
        next(ks), (OUT_DIM, 4 * MID_DIM), jnp.float32)
    p["wout"] = w_pt.T.astype(jnp.float32)
    return p


# ---------------------------------- main --------------------------------------

if __name__ == "__main__":
    key = jax.random.PRNGKey(0)
    k_in, k_par = jax.random.split(key)

    batch = 2
    # PyTorch-convention NCHW MNIST-like input; forward flattens to (N, 784).
    x = jax.random.normal(k_in, (batch, 1, 28, 28), dtype=jnp.float32)
    params = init_params(k_par)

    out = jax.block_until_ready(dense1d_forward(x, params))
    assert out.shape == (batch, OUT_DIM)
    assert bool(jnp.all(jnp.isfinite(out)))
    # rows of a log-softmax must exponentiate-and-sum to 1
    assert bool(jnp.allclose(jnp.sum(jnp.exp(out), axis=1), 1.0, atol=1e-4))
    print("KERNEL_OK")
</pallas_src>

<mosaic_0001>
module attributes {stable_mosaic.version = 11 : i64} {
  func.func @dense1d_kernel(%arg0: i32, %arg1: memref<8x784xf32, #tpu.memory_space<vmem>>, %arg2: memref<784x64xf32, #tpu.memory_space<vmem>>, %arg3: memref<1x64xf32, #tpu.memory_space<vmem>>, %arg4: memref<64x64xf32, #tpu.memory_space<vmem>>, %arg5: memref<1x64xf32, #tpu.memory_space<vmem>>, %arg6: memref<64x64xf32, #tpu.memory_space<vmem>>, %arg7: memref<1x64xf32, #tpu.memory_space<vmem>>, %arg8: memref<128x128xf32, #tpu.memory_space<vmem>>, %arg9: memref<1x128xf32, #tpu.memory_space<vmem>>, %arg10: memref<128x128xf32, #tpu.memory_space<vmem>>, %arg11: memref<1x128xf32, #tpu.memory_space<vmem>>, %arg12: memref<256x256xf32, #tpu.memory_space<vmem>>, %arg13: memref<1x256xf32, #tpu.memory_space<vmem>>, %arg14: memref<256x10xf32, #tpu.memory_space<vmem>>, %arg15: memref<8x10xf32, #tpu.memory_space<vmem>>) attributes {dimension_semantics = [#tpu.dimension_semantics<parallel>], iteration_bounds = array<i64: 1>, scalar_prefetch = 0 : i64, scratch_operands = 0 : i64, tpu.core_type = #tpu.core_type<tc>, window_params = [{transform_indices = @transform_0, window_bounds = array<i64: 8, 784>}, {pipeline_mode = #tpu.pipeline_mode<synchronous>, transform_indices = @transform_1, window_bounds = array<i64: 784, 64>}, {pipeline_mode = #tpu.pipeline_mode<synchronous>, transform_indices = @transform_2, window_bounds = array<i64: 1, 64>}, {pipeline_mode = #tpu.pipeline_mode<synchronous>, transform_indices = @transform_3, window_bounds = array<i64: 64, 64>}, {pipeline_mode = #tpu.pipeline_mode<synchronous>, transform_indices = @transform_4, window_bounds = array<i64: 1, 64>}, {pipeline_mode = #tpu.pipeline_mode<synchronous>, transform_indices = @transform_5, window_bounds = array<i64: 64, 64>}, {pipeline_mode = #tpu.pipeline_mode<synchronous>, transform_indices = @transform_6, window_bounds = array<i64: 1, 64>}, {pipeline_mode = #tpu.pipeline_mode<synchronous>, transform_indices = @transform_7, window_bounds = array<i64: 128, 128>}, {pipeline_mode = #tpu.pipeline_mode<synchronous>, transform_indices = @transform_8, window_bounds = array<i64: 1, 128>}, {pipeline_mode = #tpu.pipeline_mode<synchronous>, transform_indices = @transform_9, window_bounds = array<i64: 128, 128>}, {pipeline_mode = #tpu.pipeline_mode<synchronous>, transform_indices = @transform_10, window_bounds = array<i64: 1, 128>}, {pipeline_mode = #tpu.pipeline_mode<synchronous>, transform_indices = @transform_11, window_bounds = array<i64: 256, 256>}, {pipeline_mode = #tpu.pipeline_mode<synchronous>, transform_indices = @transform_12, window_bounds = array<i64: 1, 256>}, {pipeline_mode = #tpu.pipeline_mode<synchronous>, transform_indices = @transform_13, window_bounds = array<i64: 256, 10>}, {transform_indices = @transform_14, window_bounds = array<i64: 8, 10>}]} {
    %c0 = arith.constant 0 : index
    %c0_0 = arith.constant 0 : index
    %0 = vector.load %arg1[%c0, %c0_0] : memref<8x784xf32, #tpu.memory_space<vmem>>, vector<8x784xf32>
    %c0_1 = arith.constant 0 : index
    %c0_2 = arith.constant 0 : index
    %1 = vector.load %arg2[%c0_1, %c0_2] : memref<784x64xf32, #tpu.memory_space<vmem>>, vector<784x64xf32>
    %cst = arith.constant dense<0.000000e+00> : vector<8x64xf32>
    %2 = tpu.matmul %0, %1, %cst {dimension_numbers = #tpu.dot_dimension_numbers<[1], [0], [0], [1], [0, 0, 1, 1], [], []>} : vector<8x784xf32>, vector<784x64xf32>, vector<8x64xf32> -> vector<8x64xf32>
    %c0_3 = arith.constant 0 : index
    %c0_4 = arith.constant 0 : index
    %3 = vector.load %arg3[%c0_3, %c0_4] : memref<1x64xf32, #tpu.memory_space<vmem>>, vector<1x64xf32>
    %4 = vector.broadcast %3 : vector<1x64xf32> to vector<8x64xf32>
    %5 = arith.addf %2, %4 : vector<8x64xf32>
    %cst_5 = arith.constant 0.000000e+00 : f32
    %6 = vector.broadcast %cst_5 : f32 to vector<8x64xf32>
    %7 = arith.maximumf %5, %6 : vector<8x64xf32>
    %c0_6 = arith.constant 0 : index
    %c0_7 = arith.constant 0 : index
    %8 = vector.load %arg4[%c0_6, %c0_7] : memref<64x64xf32, #tpu.memory_space<vmem>>, vector<64x64xf32>
    %cst_8 = arith.constant dense<0.000000e+00> : vector<8x64xf32>
    %9 = tpu.matmul %7, %8, %cst_8 {dimension_numbers = #tpu.dot_dimension_numbers<[1], [0], [0], [1], [0, 0, 1, 1], [], []>} : vector<8x64xf32>, vector<64x64xf32>, vector<8x64xf32> -> vector<8x64xf32>
    %c0_9 = arith.constant 0 : index
    %c0_10 = arith.constant 0 : index
    %10 = vector.load %arg5[%c0_9, %c0_10] : memref<1x64xf32, #tpu.memory_space<vmem>>, vector<1x64xf32>
    %11 = vector.broadcast %10 : vector<1x64xf32> to vector<8x64xf32>
    %12 = arith.addf %9, %11 : vector<8x64xf32>
    %cst_11 = arith.constant 0.000000e+00 : f32
    %13 = vector.broadcast %cst_11 : f32 to vector<8x64xf32>
    %14 = arith.maximumf %12, %13 : vector<8x64xf32>
    %c0_12 = arith.constant 0 : index
    %c0_13 = arith.constant 0 : index
    %15 = vector.load %arg6[%c0_12, %c0_13] : memref<64x64xf32, #tpu.memory_space<vmem>>, vector<64x64xf32>
    %cst_14 = arith.constant dense<0.000000e+00> : vector<8x64xf32>
    %16 = tpu.matmul %14, %15, %cst_14 {dimension_numbers = #tpu.dot_dimension_numbers<[1], [0], [0], [1], [0, 0, 1, 1], [], []>} : vector<8x64xf32>, vector<64x64xf32>, vector<8x64xf32> -> vector<8x64xf32>
    %c0_15 = arith.constant 0 : index
    %c0_16 = arith.constant 0 : index
    %17 = vector.load %arg7[%c0_15, %c0_16] : memref<1x64xf32, #tpu.memory_space<vmem>>, vector<1x64xf32>
    %18 = vector.broadcast %17 : vector<1x64xf32> to vector<8x64xf32>
    %19 = arith.addf %16, %18 : vector<8x64xf32>
    %cst_17 = arith.constant 0.000000e+00 : f32
    %20 = vector.broadcast %cst_17 : f32 to vector<8x64xf32>
    %21 = arith.maximumf %19, %20 : vector<8x64xf32>
    %22 = arith.addf %21, %7 : vector<8x64xf32>
    %23 = tpu.concatenate %7, %22 in 1 : vector<8x64xf32>, vector<8x64xf32> -> vector<8x128xf32>
    %c0_18 = arith.constant 0 : index
    %c0_19 = arith.constant 0 : index
    %24 = vector.load %arg8[%c0_18, %c0_19] : memref<128x128xf32, #tpu.memory_space<vmem>>, vector<128x128xf32>
    %cst_20 = arith.constant dense<0.000000e+00> : vector<8x128xf32>
    %25 = tpu.matmul %23, %24, %cst_20 {dimension_numbers = #tpu.dot_dimension_numbers<[1], [0], [0], [1], [0, 0, 1, 1], [], []>} : vector<8x128xf32>, vector<128x128xf32>, vector<8x128xf32> -> vector<8x128xf32>
    %c0_21 = arith.constant 0 : index
    %c0_22 = arith.constant 0 : index
    %26 = vector.load %arg9[%c0_21, %c0_22] : memref<1x128xf32, #tpu.memory_space<vmem>>, vector<1x128xf32>
    %27 = vector.broadcast %26 : vector<1x128xf32> to vector<8x128xf32>
    %28 = arith.addf %25, %27 : vector<8x128xf32>
    %cst_23 = arith.constant 0.000000e+00 : f32
    %29 = vector.broadcast %cst_23 : f32 to vector<8x128xf32>
    %30 = arith.maximumf %28, %29 : vector<8x128xf32>
    %c0_24 = arith.constant 0 : index
    %c0_25 = arith.constant 0 : index
    %31 = vector.load %arg10[%c0_24, %c0_25] : memref<128x128xf32, #tpu.memory_space<vmem>>, vector<128x128xf32>
    %cst_26 = arith.constant dense<0.000000e+00> : vector<8x128xf32>
    %32 = tpu.matmul %30, %31, %cst_26 {dimension_numbers = #tpu.dot_dimension_numbers<[1], [0], [0], [1], [0, 0, 1, 1], [], []>} : vector<8x128xf32>, vector<128x128xf32>, vector<8x128xf32> -> vector<8x128xf32>
    %c0_27 = arith.constant 0 : index
    %c0_28 = arith.constant 0 : index
    %33 = vector.load %arg11[%c0_27, %c0_28] : memref<1x128xf32, #tpu.memory_space<vmem>>, vector<1x128xf32>
    %34 = vector.broadcast %33 : vector<1x128xf32> to vector<8x128xf32>
    %35 = arith.addf %32, %34 : vector<8x128xf32>
    %cst_29 = arith.constant 0.000000e+00 : f32
    %36 = vector.broadcast %cst_29 : f32 to vector<8x128xf32>
    %37 = arith.maximumf %35, %36 : vector<8x128xf32>
    %38 = arith.addf %37, %23 : vector<8x128xf32>
    %39 = tpu.concatenate %23, %38 in 1 : vector<8x128xf32>, vector<8x128xf32> -> vector<8x256xf32>
    %c0_30 = arith.constant 0 : index
    %c0_31 = arith.constant 0 : index
    %40 = vector.load %arg12[%c0_30, %c0_31] : memref<256x256xf32, #tpu.memory_space<vmem>>, vector<256x256xf32>
    %cst_32 = arith.constant dense<0.000000e+00> : vector<8x256xf32>
    %41 = tpu.matmul %39, %40, %cst_32 {dimension_numbers = #tpu.dot_dimension_numbers<[1], [0], [0], [1], [0, 0, 1, 1], [], []>} : vector<8x256xf32>, vector<256x256xf32>, vector<8x256xf32> -> vector<8x256xf32>
    %c0_33 = arith.constant 0 : index
    %c0_34 = arith.constant 0 : index
    %42 = vector.load %arg13[%c0_33, %c0_34] : memref<1x256xf32, #tpu.memory_space<vmem>>, vector<1x256xf32>
    %43 = vector.broadcast %42 : vector<1x256xf32> to vector<8x256xf32>
    %44 = arith.addf %41, %43 : vector<8x256xf32>
    %cst_35 = arith.constant 0.000000e+00 : f32
    %45 = vector.broadcast %cst_35 : f32 to vector<8x256xf32>
    %46 = arith.maximumf %44, %45 : vector<8x256xf32>
    %c0_36 = arith.constant 0 : index
    %c0_37 = arith.constant 0 : index
    %47 = vector.load %arg14[%c0_36, %c0_37] : memref<256x10xf32, #tpu.memory_space<vmem>>, vector<256x10xf32>
    %cst_38 = arith.constant dense<0.000000e+00> : vector<8x10xf32>
    %48 = tpu.matmul %46, %47, %cst_38 {dimension_numbers = #tpu.dot_dimension_numbers<[1], [0], [0], [1], [0, 0, 1, 1], [], []>} : vector<8x256xf32>, vector<256x10xf32>, vector<8x10xf32> -> vector<8x10xf32>
    %cst_39 = arith.constant dense<0xFF800000> : vector<8xf32>
    %49 = vector.multi_reduction <maximumf>, %48, %cst_39 [1] : vector<8x10xf32> to vector<8xf32>
    %50 = vector.shape_cast %49 : vector<8xf32> to vector<8x1xf32>
    %51 = vector.broadcast %50 : vector<8x1xf32> to vector<8x10xf32>
    %52 = arith.subf %48, %51 : vector<8x10xf32>
    %53 = math.exp %52 : vector<8x10xf32>
    %cst_40 = arith.constant dense<0.000000e+00> : vector<8xf32>
    %54 = vector.multi_reduction <add>, %53, %cst_40 [1] : vector<8x10xf32> to vector<8xf32>
    %55 = vector.shape_cast %54 : vector<8xf32> to vector<8x1xf32>
    %56 = math.log %55 : vector<8x1xf32>
    %57 = arith.addf %50, %56 : vector<8x1xf32>
    %58 = vector.broadcast %57 : vector<8x1xf32> to vector<8x10xf32>
    %59 = arith.subf %48, %58 : vector<8x10xf32>
    %c0_41 = arith.constant 0 : index
    %c0_42 = arith.constant 0 : index
    %60 = vector.load %arg15[%c0_41, %c0_42] : memref<8x10xf32, #tpu.memory_space<vmem>>, vector<8x10xf32>
    tpu.vector_store %arg15[%c0_41, %c0_42], %59 {strides = array<i32>} : memref<8x10xf32, #tpu.memory_space<vmem>>, vector<8x10xf32>,
    return
  }
  func.func @transform_0(%arg0: i32) -> (i32, i32) {
    %c0_i32 = arith.constant 0 : i32
    %c0_i32_0 = arith.constant 0 : i32
    return %arg0, %c0_i32 : i32, i32
  }
  func.func @transform_1(%arg0: i32) -> (i32, i32) {
    %c0_i32 = arith.constant 0 : i32
    %c0_i32_0 = arith.constant 0 : i32
    %c0_i32_1 = arith.constant 0 : i32
    return %c0_i32, %c0_i32_0 : i32, i32
  }
  func.func @transform_2(%arg0: i32) -> (i32, i32) {
    %c0_i32 = arith.constant 0 : i32
    %c0_i32_0 = arith.constant 0 : i32
    %c0_i32_1 = arith.constant 0 : i32
    return %c0_i32, %c0_i32_0 : i32, i32
  }
  func.func @transform_3(%arg0: i32) -> (i32, i32) {
    %c0_i32 = arith.constant 0 : i32
    %c0_i32_0 = arith.constant 0 : i32
    %c0_i32_1 = arith.constant 0 : i32
    return %c0_i32, %c0_i32_0 : i32, i32
  }
  func.func @transform_4(%arg0: i32) -> (i32, i32) {
    %c0_i32 = arith.constant 0 : i32
    %c0_i32_0 = arith.constant 0 : i32
    %c0_i32_1 = arith.constant 0 : i32
    return %c0_i32, %c0_i32_0 : i32, i32
  }
  func.func @transform_5(%arg0: i32) -> (i32, i32) {
    %c0_i32 = arith.constant 0 : i32
    %c0_i32_0 = arith.constant 0 : i32
    %c0_i32_1 = arith.constant 0 : i32
    return %c0_i32, %c0_i32_0 : i32, i32
  }
  func.func @transform_6(%arg0: i32) -> (i32, i32) {
    %c0_i32 = arith.constant 0 : i32
    %c0_i32_0 = arith.constant 0 : i32
    %c0_i32_1 = arith.constant 0 : i32
    return %c0_i32, %c0_i32_0 : i32, i32
  }
  func.func @transform_7(%arg0: i32) -> (i32, i32) {
    %c0_i32 = arith.constant 0 : i32
    %c0_i32_0 = arith.constant 0 : i32
    %c0_i32_1 = arith.constant 0 : i32
    return %c0_i32, %c0_i32_0 : i32, i32
  }
  func.func @transform_8(%arg0: i32) -> (i32, i32) {
    %c0_i32 = arith.constant 0 : i32
    %c0_i32_0 = arith.constant 0 : i32
    %c0_i32_1 = arith.constant 0 : i32
    return %c0_i32, %c0_i32_0 : i32, i32
  }
  func.func @transform_9(%arg0: i32) -> (i32, i32) {
    %c0_i32 = arith.constant 0 : i32
    %c0_i32_0 = arith.constant 0 : i32
    %c0_i32_1 = arith.constant 0 : i32
    return %c0_i32, %c0_i32_0 : i32, i32
  }
  func.func @transform_10(%arg0: i32) -> (i32, i32) {
    %c0_i32 = arith.constant 0 : i32
    %c0_i32_0 = arith.constant 0 : i32
    %c0_i32_1 = arith.constant 0 : i32
    return %c0_i32, %c0_i32_0 : i32, i32
  }
  func.func @transform_11(%arg0: i32) -> (i32, i32) {
    %c0_i32 = arith.constant 0 : i32
    %c0_i32_0 = arith.constant 0 : i32
    %c0_i32_1 = arith.constant 0 : i32
    return %c0_i32, %c0_i32_0 : i32, i32
  }
  func.func @transform_12(%arg0: i32) -> (i32, i32) {
    %c0_i32 = arith.constant 0 : i32
    %c0_i32_0 = arith.constant 0 : i32
    %c0_i32_1 = arith.constant 0 : i32
    return %c0_i32, %c0_i32_0 : i32, i32
  }
  func.func @transform_13(%arg0: i32) -> (i32, i32) {
    %c0_i32 = arith.constant 0 : i32
    %c0_i32_0 = arith.constant 0 : i32
    %c0_i32_1 = arith.constant 0 : i32
    return %c0_i32, %c0_i32_0 : i32, i32
  }
  func.func @transform_14(%arg0: i32) -> (i32, i32) {
    %c0_i32 = arith.constant 0 : i32
    %c0_i32_0 = arith.constant 0 : i32
    return %arg0, %c0_i32 : i32, i32
  }
}

</mosaic_0001>

<bundles_post_ra>
// kernel: dense1d_forward.1
= control target key start
LH: loop header
LB: loop body
LE: loop exit
PB: predicated region body
PF: predicated region fallthrough
CT: control target
= control target key end

     0   :  { %vm1682_vm0 = vmmov 0   ;;  %vm159_vm1 = vcmask 130048   ;;  %vm459_vm2 = vcmask 523264   ;;  %s1684_s15 = smov 64   ;;  %vm1069_vm3 = vcmask 80896   ;;  %s2579_s1 = inlined_call_operand.vmem [shape: f32[784,64], index: 1, kind: input, shape index: {}]   ;;  %s2580_s0 = inlined_call_operand.vmem [shape: f32[8,784], index: 0, kind: input, shape index: {}]   ;;  %s2581_s3 = inlined_call_operand.vmem [shape: f32[64,64], index: 3, kind: input, shape index: {}]   ;;  %s2582_s2 = inlined_call_operand.vmem [shape: f32[1,64], index: 2, kind: input, shape index: {}]   ;;  %s2583_s5 = inlined_call_operand.vmem [shape: f32[64,64], index: 5, kind: input, shape index: {}]   ;;  %s2584_s4 = inlined_call_operand.vmem [shape: f32[1,64], index: 4, kind: input, shape index: {}]   ;;  %s2585_s7 = inlined_call_operand.vmem [shape: f32[128,128], index: 7, kind: input, shape index: {}]   ;;  %s2586_s6 = inlined_call_operand.vmem [shape: f32[1,64], index: 6, kind: input, shape index: {}]   ;;  %s2587_s9 = inlined_call_operand.vmem [shape: f32[128,128], index: 9, kind: input, shape index: {}]   ;;  %s2588_s11 = inlined_call_operand.vmem [shape: f32[256,256], index: 11, kind: input, shape index: {}]   ;;  %s2589_s8 = inlined_call_operand.vmem [shape: f32[1,128], index: 8, kind: input, shape index: {}]   ;;  %s2590_s13 = inlined_call_operand.vmem [shape: f32[256,10], index: 13, kind: input, shape index: {}]   ;;  %s2591_s10 = inlined_call_operand.vmem [shape: f32[1,128], index: 10, kind: input, shape index: {}]   ;;  %s2592_s12 = inlined_call_operand.vmem [shape: f32[1,256], index: 12, kind: input, shape index: {}]   ;;  %s2593_s14 = inlined_call_operand.vmem [shape: f32[8,10], index: 14, kind: output, shape index: {}]  }
   0x1   :  { %v70_v0 = vld [vmem:[%s2579_s1 + $0x80] sm:$0xff]  ;;  %v71_v1 = vld [vmem:[%s2579_s1 + $0x88] sm:$0xff]  ;;  %v72_v11 = vld [vmem:[%s2579_s1 + $0x90] sm:$0xff] }
   0x2   :  { %v54_v2 = vld [vmem:[%s2579_s1] sm:$0xff]  ;;  %v1406_v3 = vpack.c.bf16 %v71_v1, %v70_v0  ;;  %v55_v4 = vld [vmem:[%s2579_s1 + $0x8] sm:$0xff]  ;;  %v73_v13 = vld [vmem:[%s2579_s1 + $0x98] sm:$0xff] }
   0x3   :  { %v102_v5 = vld [vmem:[%s2579_s1 + $0x180] sm:$0xff]  ;;  %v103_v6 = vld [vmem:[%s2579_s1 + $0x188] sm:$0xff]  ;;  %v1408_v7 = vpack.c.bf16 %v55_v4, %v54_v2  ;;  %v56_v14 = vld [vmem:[%s2579_s1 + $0x10] sm:$0xff]  ;;  %v1410_v16 = vpack.c.bf16 %v73_v13, %v72_v11 }
   0x4   :  { %v1438_v8 = vpack.c.bf16 %v103_v6, %v102_v5  ;;  %v86_v9 = vld [vmem:[%s2579_s1 + $0x100] sm:$0xff]  ;;  %v87_v10 = vld [vmem:[%s2579_s1 + $0x108] sm:$0xff]  ;;  %1407 = vmatprep.subr.bf16.mxu0 %v1406_v3  ;;  %v57_v15 = vld [vmem:[%s2579_s1 + $0x18] sm:$0xff] }
   0x5   :  { %v1440_v12 = vpack.c.bf16 %v87_v10, %v86_v9  ;;  %1409 = vmatpush3.bf16.msra.mxu0 %v1408_v7  ;;  %v1412_v17 = vpack.c.bf16 %v57_v15, %v56_v14  ;;  %v104_v18 = vld [vmem:[%s2579_s1 + $0x190] sm:$0xff]  ;;  %v105_v19 = vld [vmem:[%s2579_s1 + $0x198] sm:$0xff]  ;;  %v74_v23 = vld [vmem:[%s2579_s1 + $0xa0] sm:$0xff] }
   0x6   :  { %1439 = vmatprep.subr.bf16.mxu1 %v1438_v8  ;;  %v88_v20 = vld [vmem:[%s2579_s1 + $0x110] sm:$0xff]  ;;  %v1442_v21 = vpack.c.bf16 %v105_v19, %v104_v18  ;;  %v89_v22 = vld [vmem:[%s2579_s1 + $0x118] sm:$0xff]  ;;  %v75_v24 = vld [vmem:[%s2579_s1 + $0xa8] sm:$0xff]  ;;  %1411 = vmatprep.subr.bf16.mxu0 %v1410_v16 }
   0x7   :  { %1441 = vmatpush3.bf16.msra.mxu1 %v1440_v12  ;;  %v1444_v25 = vpack.c.bf16 %v89_v22, %v88_v20  ;;  %v1414_v26 = vpack.c.bf16 %v75_v24, %v74_v23  ;;  %v58_v27 = vld [vmem:[%s2579_s1 + $0x20] sm:$0xff]  ;;  %v59_v28 = vld [vmem:[%s2579_s1 + $0x28] sm:$0xff]  ;;  %v76_v35 = vld [vmem:[%s2579_s1 + $0xb0] sm:$0xff] }
   0x8   :  { %v106_v29 = vld [vmem:[%s2579_s1 + $0x1a0] sm:$0xff]  ;;  %1443 = vmatprep.subr.bf16.mxu1 %v1442_v21  ;;  %v107_v30 = vld [vmem:[%s2579_s1 + $0x1a8] sm:$0xff]  ;;  %v1416_v33 = vpack.c.bf16 %v59_v28, %v58_v27  ;;  %v77_v36 = vld [vmem:[%s2579_s1 + $0xb8] sm:$0xff] }
   0x9   :  { %v90_v31 = vld [vmem:[%s2579_s1 + $0x120] sm:$0xff]  ;;  %v91_v32 = vld [vmem:[%s2579_s1 + $0x128] sm:$0xff]  ;;  %1413 = vmatpush3.bf16.msra.mxu0 %v1412_v17  ;;  %v1446_v34 = vpack.c.bf16 %v107_v30, %v106_v29  ;;  %v60_v37 = vld [vmem:[%s2579_s1 + $0x30] sm:$0xff]  ;;  %v1418_v39 = vpack.c.bf16 %v77_v36, %v76_v35 }
   0xa   :  { %1415 = vmatprep.subr.bf16.mxu0 %v1414_v26  ;;  %v1448_v38 = vpack.c.bf16 %v91_v32, %v90_v31  ;;  %v61_v40 = vld [vmem:[%s2579_s1 + $0x38] sm:$0xff]  ;;  %v108_v41 = vld [vmem:[%s2579_s1 + $0x1b0] sm:$0xff]  ;;  %v78_v46 = vld [vmem:[%s2579_s1 + $0xc0] sm:$0xff] }
   0xb   :  { %1445 = vmatpush3.bf16.msra.mxu1 %v1444_v25  ;;  %v109_v42 = vld [vmem:[%s2579_s1 + $0x1b8] sm:$0xff]  ;;  %v92_v44 = vld [vmem:[%s2579_s1 + $0x130] sm:$0xff]  ;;  %v79_v47 = vld [vmem:[%s2579_s1 + $0xc8] sm:$0xff]  ;;  %v1420_v48 = vpack.c.bf16 %v61_v40, %v60_v37 }
   0xc   :  { %1447 = vmatprep.subr.bf16.mxu1 %v1446_v34  ;;  %v1450_v43 = vpack.c.bf16 %v109_v42, %v108_v41  ;;  %v93_v45 = vld [vmem:[%s2579_s1 + $0x138] sm:$0xff]  ;;  %v110_v49 = vld [vmem:[%s2579_s1 + $0x1c0] sm:$0xff]  ;;  %v111_v50 = vld [vmem:[%s2579_s1 + $0x1c8] sm:$0xff]  ;;  %v1422_v52 = vpack.c.bf16 %v79_v47, %v78_v46 }
   0xd   :  { %1417 = vmatpush3.bf16.msra.mxu0 %v1416_v33  ;;  %v1452_v51 = vpack.c.bf16 %v93_v45, %v92_v44  ;;  %v62_v53 = vld [vmem:[%s2579_s1 + $0x40] sm:$0xff]  ;;  %v63_v54 = vld [vmem:[%s2579_s1 + $0x48] sm:$0xff]  ;;  %v1454_v56 = vpack.c.bf16 %v111_v50, %v110_v49  ;;  %v80_v58 = vld [vmem:[%s2579_s1 + $0xd0] sm:$0xff]  ;;  %v1681_v50 = vmov 0.0|0.0  }
   0xe   :  { %1419 = vmatprep.subr.bf16.mxu0 %v1418_v39  ;;  %v94_v55 = vld [vmem:[%s2579_s1 + $0x140] sm:$0xff]  ;;  %v95_v57 = vld [vmem:[%s2579_s1 + $0x148] sm:$0xff]  ;;  %v81_v59 = vld [vmem:[%s2579_s1 + $0xd8] sm:$0xff]  ;;  %v1424_v62 = vpack.c.bf16 %v63_v54, %v62_v53 }
   0xf   :  { %1449 = vmatpush3.bf16.msra.mxu1 %v1448_v38  ;;  %v112_v60 = vld [vmem:[%s2579_s1 + $0x1d0] sm:$0xff]  ;;  %v113_v61 = vld [vmem:[%s2579_s1 + $0x1d8] sm:$0xff]  ;;  %v1456_v63 = vpack.c.bf16 %v95_v57, %v94_v55  ;;  %v1426_v0 = vpack.c.bf16 %v81_v59, %v80_v58  ;;  %v82_v6 = vld [vmem:[%s2579_s1 + $0xe0] sm:$0xff] }
  0x10   :  { %1451 = vmatprep.subr.bf16.mxu1 %v1450_v43  ;;  %v64_v1 = vld [vmem:[%s2579_s1 + $0x50] sm:$0xff]  ;;  %v65_v2 = vld [vmem:[%s2579_s1 + $0x58] sm:$0xff]  ;;  %v1458_v4 = vpack.c.bf16 %v113_v61, %v112_v60  ;;  %v83_v7 = vld [vmem:[%s2579_s1 + $0xe8] sm:$0xff]  ;;  %v1683_v60 = vmov 0.0  }
  0x11   :  { %1421 = vmatpush3.bf16.msra.mxu0 %v1420_v48  ;;  %v96_v3 = vld [vmem:[%s2579_s1 + $0x150] sm:$0xff]  ;;  %v97_v5 = vld [vmem:[%s2579_s1 + $0x158] sm:$0xff]  ;;  %v114_v8 = vld [vmem:[%s2579_s1 + $0x1e0] sm:$0xff]  ;;  %v1428_v10 = vpack.c.bf16 %v65_v2, %v64_v1  ;;  %v1430_v14 = vpack.c.bf16 %v83_v7, %v82_v6 }
  0x12   :  { %1423 = vmatprep.subr.bf16.mxu0 %v1422_v52  ;;  %v115_v9 = vld [vmem:[%s2579_s1 + $0x1e8] sm:$0xff]  ;;  %v66_v11 = vld [vmem:[%s2579_s1 + $0x60] sm:$0xff]  ;;  %v1460_v13 = vpack.c.bf16 %v97_v5, %v96_v3  ;;  %v84_v19 = vld [vmem:[%s2579_s1 + $0xf0] sm:$0xff] }
  0x13   :  { %1453 = vmatpush3.bf16.msra.mxu1 %v1452_v51  ;;  %v48_v12 = vld [vmem:[%s2580_s0 + $0x8] sm:$0xff]  ;;  %v98_v16 = vld [vmem:[%s2579_s1 + $0x160] sm:$0xff]  ;;  %v1462_v18 = vpack.c.bf16 %v115_v9, %v114_v8  ;;  %v85_v20 = vld [vmem:[%s2579_s1 + $0xf8] sm:$0xff] }
  0x14   :  { %1455 = vmatprep.subr.bf16.mxu1 %v1454_v56  ;;  %v67_v15 = vld [vmem:[%s2579_s1 + $0x68] sm:$0xff]  ;;  %227 = vmatprep.mubr.f32.mxu0 %v48_v12  ;;  %v50_v21 = vld [vmem:[%s2580_s0 + $0x18] sm:$0xff]  ;;  %v116_v22 = vld [vmem:[%s2579_s1 + $0x1f0] sm:$0xff]  ;;  %v1434_v26 = vpack.c.bf16 %v85_v20, %v84_v19 }
  0x15   :  { %1425 = vmatpush3.bf16.msra.mxu0 %v1424_v62  ;;  %v99_v17 = vld [vmem:[%s2579_s1 + $0x168] sm:$0xff]  ;;  %v117_v23 = vld [vmem:[%s2579_s1 + $0x1f8] sm:$0xff]  ;;  %297 = vmatprep.mubr.f32.mxu1 %v50_v21  ;;  %v1432_v24 = vpack.c.bf16 %v67_v15, %v66_v11  ;;  %v68_v27 = vld [vmem:[%s2579_s1 + $0x70] sm:$0xff] }
  0x16   :  { %1427 = vmatprep.subr.bf16.mxu0 %v1426_v0  ;;  %v1464_v25 = vpack.c.bf16 %v99_v17, %v98_v16  ;;  %v69_v28 = vld [vmem:[%s2579_s1 + $0x78] sm:$0xff]  ;;  %v100_v29 = vld [vmem:[%s2579_s1 + $0x170] sm:$0xff]  ;;  %v1466_v30 = vpack.c.bf16 %v117_v23, %v116_v22  ;;  %v134_v32 = vld [vmem:[%s2579_s1 + $0x280] sm:$0xff] }
  0x17   :  { %1457 = vmatpush3.bf16.msra.mxu1 %v1456_v63  ;;  %v101_v31 = vld [vmem:[%s2579_s1 + $0x178] sm:$0xff]  ;;  %v135_v33 = vld [vmem:[%s2579_s1 + $0x288] sm:$0xff]  ;;  %v1436_v34 = vpack.c.bf16 %v69_v28, %v68_v27  ;;  %v118_v37 = vld [vmem:[%s2579_s1 + $0x200] sm:$0xff] }
  0x18   :  { %1459 = vmatprep.subr.bf16.mxu1 %v1458_v4  ;;  %v1468_v35 = vpack.c.bf16 %v101_v31, %v100_v29  ;;  %v1470_v36 = vpack.c.bf16 %v135_v33, %v134_v32  ;;  %v119_v38 = vld [vmem:[%s2579_s1 + $0x208] sm:$0xff]  ;;  %v136_v39 = vld [vmem:[%s2579_s1 + $0x290] sm:$0xff]  ;;  %v137_v40 = vld [vmem:[%s2579_s1 + $0x298] sm:$0xff] }
  0x19   :  { %1429 = vmatpush3.bf16.msra.mxu0 %v1428_v10  ;;  %v47_v41 = vld [vmem:[%s2580_s0] sm:$0xff]  ;;  %v1472_v42 = vpack.c.bf16 %v119_v38, %v118_v37  ;;  %v49_v43 = vld [vmem:[%s2580_s0 + $0x10] sm:$0xff]  ;;  %v1474_v45 = vpack.c.bf16 %v137_v40, %v136_v39  ;;  %v121_v46 = vld [vmem:[%s2579_s1 + $0x218] sm:$0xff] }
  0x1a   :  { %1431 = vmatprep.subr.bf16.mxu0 %v1430_v14  ;;  %v120_v44 = vld [vmem:[%s2579_s1 + $0x210] sm:$0xff]  ;;  %v138_v47 = vld [vmem:[%s2579_s1 + $0x2a0] sm:$0xff]  ;;  %v139_v48 = vld [vmem:[%s2579_s1 + $0x2a8] sm:$0xff] }
  0x1b   :  { %1461 = vmatpush3.bf16.msra.mxu1 %v1460_v13  ;;  %v52_v49 = vld [vmem:[%s2580_s0 + $0x28] sm:$0xff]  ;;  %v150_v51 = vld [vmem:[%s2579_s1 + $0x300] sm:$0xff]  ;;  %v1476_v54 = vpack.c.bf16 %v121_v46, %v120_v44  ;;  %v1478_v55 = vpack.c.bf16 %v139_v48, %v138_v47  ;;  %v140_v58 = vld [vmem:[%s2579_s1 + $0x2b0] sm:$0xff] }
  0x1c   :  { %1463 = vmatprep.subr.bf16.mxu1 %v1462_v18  ;;  %v151_v52 = vld [vmem:[%s2579_s1 + $0x308] sm:$0xff]  ;;  %v122_v56 = vld [vmem:[%s2579_s1 + $0x220] sm:$0xff]  ;;  %v141_v59 = vld [vmem:[%s2579_s1 + $0x2b8] sm:$0xff] }
  0x1d   :  { %1433 = vmatpush3.bf16.msra.mxu0 %v1432_v24  ;;  %v1503_v53 = vpack.c.bf16 %v151_v52, %v150_v51  ;;  %v123_v57 = vld [vmem:[%s2579_s1 + $0x228] sm:$0xff]  ;;  %v53_v61 = vld [vmem:[%s2580_s0 + $0x30] sm:$0xff]  ;;  %v1482_v63 = vpack.c.bf16 %v141_v59, %v140_v58  ;;  %v125_v1 = vld [vmem:[%s2579_s1 + $0x238] sm:$0xff] }
  0x1e   :  { %1435 = vmatprep.subr.bf16.mxu0 %v1434_v26  ;;  %v1480_v62 = vpack.c.bf16 %v123_v57, %v122_v56  ;;  %v124_v0 = vld [vmem:[%s2579_s1 + $0x230] sm:$0xff]  ;;  %v142_v2 = vld [vmem:[%s2579_s1 + $0x2c0] sm:$0xff]  ;;  %v143_v3 = vld [vmem:[%s2579_s1 + $0x2c8] sm:$0xff] }
  0x1f   :  { %1465 = vmatpush3.bf16.msra.mxu1 %v1464_v25  ;;  %v1484_v4 = vpack.c.bf16 %v125_v1, %v124_v0  ;;  %v1486_v5 = vpack.c.bf16 %v143_v3, %v142_v2  ;;  %v126_v6 = vld [vmem:[%s2579_s1 + $0x240] sm:$0xff]  ;;  %v127_v7 = vld [vmem:[%s2579_s1 + $0x248] sm:$0xff]  ;;  %v144_v8 = vld [vmem:[%s2579_s1 + $0x2d0] sm:$0xff] }
  0x20   :  { %1467 = vmatprep.subr.bf16.mxu1 %v1466_v30  ;;  %v145_v9 = vld [vmem:[%s2579_s1 + $0x2d8] sm:$0xff]  ;;  %v1488_v10 = vpack.c.bf16 %v127_v7, %v126_v6  ;;  %v128_v12 = vld [vmem:[%s2579_s1 + $0x250] sm:$0xff]  ;;  %v146_v14 = vld [vmem:[%s2579_s1 + $0x2e0] sm:$0xff] }
  0x21   :  { %1437 = vmatpush3.bf16.msra.mxu0 %v1436_v34  ;;  %v1490_v11 = vpack.c.bf16 %v145_v9, %v144_v8  ;;  %v129_v13 = vld [vmem:[%s2579_s1 + $0x258] sm:$0xff]  ;;  %v147_v15 = vld [vmem:[%s2579_s1 + $0x2e8] sm:$0xff]  ;;  %v130_v18 = vld [vmem:[%s2579_s1 + $0x260] sm:$0xff] }
  0x22   :  { %1471 = vmatprep.subr.bf16.mxu0 %v1470_v36  ;;  %v1492_v16 = vpack.c.bf16 %v129_v13, %v128_v12  ;;  %v1494_v17 = vpack.c.bf16 %v147_v15, %v146_v14  ;;  %v131_v19 = vld [vmem:[%s2579_s1 + $0x268] sm:$0xff]  ;;  %v148_v20 = vld [vmem:[%s2579_s1 + $0x2f0] sm:$0xff]  ;;  %v149_v21 = vld [vmem:[%s2579_s1 + $0x2f8] sm:$0xff] }
  0x23   :  { %1469 = vmatpush3.bf16.msra.mxu1 %v1468_v35  ;;  %v1496_v22 = vpack.c.bf16 %v131_v19, %v130_v18  ;;  %v1498_v23 = vpack.c.bf16 %v149_v21, %v148_v20  ;;  %v132_v24 = vld [vmem:[%s2579_s1 + $0x270] sm:$0xff]  ;;  %v133_v25 = vld [vmem:[%s2579_s1 + $0x278] sm:$0xff]  ;;  %v51_v27 = vld [vmem:[%s2580_s0 + $0x20] sm:$0xff] }
  0x24   :  { %1502 = vmatprep.subr.bf16.mxu1 %v1681_v50  ;;  %228 = vmatmul.mubr.f32.vlgmr.msra.gmra.mrb[0].mxu0 %v47_v41  ;;  %v1500_v26 = vpack.c.bf16 %v133_v25, %v132_v24  ;;  %v444_v28 = vld [vmem:[%s2581_s3] sm:$0xff]  ;;  %v445_v29 = vld [vmem:[%s2581_s3 + $0x8] sm:$0xff]  ;;  %v446_v30 = vld [vmem:[%s2581_s3 + $0x10] sm:$0xff] }
  0x25   :  { %1473 = vmatpush3.bf16.msra.mxu0 %v1472_v42  ;;  %367 = vmatprep.mubr.f32.mxu0 %v52_v49  ;;  %v1506_v31 = vpack.c.bf16 %v445_v29, %v444_v28  ;;  %v447_v32 = vld [vmem:[%s2581_s3 + $0x18] sm:$0xff]  ;;  %v448_v34 = vld [vmem:[%s2581_s3 + $0x20] sm:$0xff]  ;;  %v449_v35 = vld [vmem:[%s2581_s3 + $0x28] sm:$0xff] }
  0x26   :  { %298 = vmatmul.mubr.f32.vlgmr.msra.gmra.mrb[0].mxu1 %v49_v43  ;;  %1475 = vmatprep.subr.bf16.mxu0 %v1474_v45  ;;  %v1509_v33 = vpack.c.bf16 %v447_v32, %v446_v30  ;;  %v1512_v36 = vpack.c.bf16 %v449_v35, %v448_v34  ;;  %v450_v37 = vld [vmem:[%s2581_s3 + $0x30] sm:$0xff]  ;;  %v451_v38 = vld [vmem:[%s2581_s3 + $0x38] sm:$0xff]  ;;  %v1088_v41 = vld [vmem:[%s2582_s2] ss:$0 sm:$0xff] }
  0x27   :  { %1504 = vmatpush3.bf16.msra.mxu1 %v1503_v53  ;;  %1295 = vmatprep.mubr.msk.f32.mxu1 %vm1682_vm0, %v1683_v60  ;;  %v1515_v39 = vpack.c.bf16 %v451_v38, %v450_v37  ;;  %v534_v56 = vld [vmem:[%s2583_s5] sm:$0xff]  ;;  %v535_v57 = vld [vmem:[%s2583_s5 + $0x8] sm:$0xff]  ;;  %v631_v14 = vld [vmem:[%s2585_s7 + $0x10] sm:$0xff] }
  0x28   :  { %1505 = vmatprep.subr.bf16.mxu1 %v1681_v50  ;;  %v1518_v59 = vpack.c.bf16 %v535_v57, %v534_v56  ;;  %v538_v1 = vld [vmem:[%s2583_s5 + $0x20] sm:$0xff]  ;;  %v539_v2 = vld [vmem:[%s2583_s5 + $0x28] sm:$0xff]  ;;  %v635_v20 = vld [vmem:[%s2585_s7 + $0x30] sm:$0xff] }
  0x29   :  { %1477 = vmatpush3.bf16.msra.mxu0 %v1476_v54  ;;  %v1524_v3 = vpack.c.bf16 %v539_v2, %v538_v1  ;;  %v1090_v7 = vld [vmem:[%s2584_s4] ss:$0 sm:$0xff]  ;;  %v630_v13 = vld [vmem:[%s2585_s7 + $0x8] sm:$0xff]  ;;  %v636_v21 = vld [vmem:[%s2585_s7 + $0x38] sm:$0xff] }
  0x2a   :  { %1479 = vmatprep.subr.bf16.mxu0 %v1478_v55  ;;  %1296 = vmatmul.mubr.msk.f32.vlgmr.msra.gmra.mrb[2].mxu1 %vm159_vm1, %v53_v61  ;;  %v629_v12 = vld [vmem:[%s2585_s7] sm:$0xff]  ;;  %v634_v18 = vld [vmem:[%s2585_s7 + $0x28] sm:$0xff]  ;;  %v643_v32 = vld [vmem:[%s2585_s7 + $0x70] sm:$0xff] }
  0x2b   :  { %1314 = vmatprep.mubr.msk.f32.mxu1 %vm1682_vm0, %v1683_v60  ;;  %1507 = vmatpush3.bf16.msra.mxu1 %v1506_v31  ;;  %v1530_v15 = vpack.c.bf16 %v630_v13, %v629_v12  ;;  %v638_v24 = vld [vmem:[%s2585_s7 + $0x48] sm:$0xff]  ;;  %v641_v29 = vld [vmem:[%s2585_s7 + $0x60] sm:$0xff]  ;;  %v725_v37 = vld [vmem:[%s2587_s9 + $0x10] sm:$0xff] }
  0x2c   :  { %1508 = vmatprep.subr.bf16.mxu1 %v1681_v50  ;;  %v642_v30 = vld [vmem:[%s2585_s7 + $0x68] sm:$0xff]  ;;  %v723_v35 = vld [vmem:[%s2587_s9] sm:$0xff]  ;;  %v733_v57 = vld [vmem:[%s2587_s9 + $0x50] sm:$0xff] }
  0x2d   :  { %1481 = vmatpush3.bf16.msra.mxu0 %v1480_v62  ;;  %v536_v62 = vld [vmem:[%s2583_s5 + $0x10] sm:$0xff]  ;;  %v1548_v31 = vpack.c.bf16 %v642_v30, %v641_v29  ;;  %v822_v13 = vld [vmem:[%s2588_s11 + $0x20] sm:$0xff] }
  0x2e   :  { %1483 = vmatprep.subr.bf16.mxu0 %v1482_v63  ;;  %v537_v63 = vld [vmem:[%s2583_s5 + $0x18] sm:$0xff]  ;;  %v834_v30 = vld [vmem:[%s2588_s11 + $0x80] sm:$0xff] }
  0x2f   :  { %1510 = vmatpush3.bf16.msra.mxu1 %v1509_v33  ;;  %v1521_v0 = vpack.c.bf16 %v537_v63, %v536_v62  ;;  %v644_v33 = vld [vmem:[%s2585_s7 + $0x78] sm:$0xff]  ;;  %v735_v62 = vld [vmem:[%s2587_s9 + $0x60] sm:$0xff]  ;;  %v736_v63 = vld [vmem:[%s2587_s9 + $0x68] sm:$0xff] }
  0x30   :  { %1511 = vmatprep.subr.bf16.mxu1 %v1681_v50  ;;  %v1551_v34 = vpack.c.bf16 %v644_v33, %v643_v32  ;;  %v839_v32 = vld [vmem:[%s2588_s11 + $0xa8] sm:$0xff]  ;;  %v841_v33 = vld [vmem:[%s2588_s11 + $0xb8] sm:$0xff] }
  0x31   :  { %1485 = vmatpush3.bf16.msra.mxu0 %v1484_v4  ;;  %v540_v4 = vld [vmem:[%s2583_s5 + $0x30] sm:$0xff] }
  0x32   :  { %1487 = vmatprep.subr.bf16.mxu0 %v1486_v5  ;;  %v541_v5 = vld [vmem:[%s2583_s5 + $0x38] sm:$0xff] }
  0x33   :  { %1513 = vmatpush3.bf16.msra.mxu1 %v1512_v36  ;;  %v1527_v6 = vpack.c.bf16 %v541_v5, %v540_v4  ;;  %v724_v36 = vld [vmem:[%s2587_s9 + $0x8] sm:$0xff]  ;;  %v738_v4 = vld [vmem:[%s2587_s9 + $0x78] sm:$0xff] }
  0x34   :  { %1514 = vmatprep.subr.bf16.mxu1 %v1681_v50  ;;  %v1554_v38 = vpack.c.bf16 %v724_v36, %v723_v35  ;;  %v1597_v35 = vpack.c.bf16 %v841_v33, %v839_v32  ;;  %v838_v36 = vld [vmem:[%s2588_s11 + $0xa0] sm:$0xff]  ;;  %v876_v33 = vld [vmem:[%s2588_s11 + $0x1d0] sm:$0xff] }
  0x35   :  { %1489 = vmatpush3.bf16.msra.mxu0 %v1488_v10  ;;  %v874_v32 = vld [vmem:[%s2588_s11 + $0x1c0] sm:$0xff] }
  0x36   :  { %1491 = vmatprep.subr.bf16.mxu0 %v1490_v11 }
  0x37   :  { %1516 = vmatpush3.bf16.msra.mxu1 %v1515_v39  ;;  %v726_v39 = vld [vmem:[%s2587_s9 + $0x18] sm:$0xff] }
  0x38   :  { %1517 = vmatprep.subr.bf16.mxu1 %v1681_v50 }
  0x39   :  { %1493 = vmatpush3.bf16.msra.mxu0 %v1492_v16  ;;  %v632_v16 = vld [vmem:[%s2585_s7 + $0x18] sm:$0xff] }
  0x3a   :  { %1495 = vmatprep.subr.bf16.mxu0 %v1494_v17  ;;  %v1533_v17 = vpack.c.bf16 %v632_v16, %v631_v14  ;;  %v824_v14 = vld [vmem:[%s2588_s11 + $0x30] sm:$0xff]  ;;  %v829_v16 = vld [vmem:[%s2588_s11 + $0x58] sm:$0xff] }
  0x3d   :  { %1497 = vmatpush3.bf16.msra.mxu0 %v1496_v22  ;;  %v1539_v22 = vpack.c.bf16 %v636_v21, %v635_v20  ;;  %v831_v20 = vld [vmem:[%s2588_s11 + $0x68] sm:$0xff]  ;;  %v833_v21 = vld [vmem:[%s2588_s11 + $0x78] sm:$0xff] }
  0x3e   :  { %1499 = vmatprep.subr.bf16.mxu0 %v1498_v23  ;;  %v637_v23 = vld [vmem:[%s2585_s7 + $0x40] sm:$0xff] }
  0x3f   :  { %v1542_v25 = vpack.c.bf16 %v638_v24, %v637_v23  ;;  %v1589_v23 = vpack.c.bf16 %v833_v21, %v831_v20  ;;  %v830_v24 = vld [vmem:[%s2588_s11 + $0x60] sm:$0xff] }
  0x40   :  { %v870_v21 = vld [vmem:[%s2588_s11 + $0x1a0] sm:$0xff] }
  0x41   :  { %1501 = vmatpush3.bf16.msra.mxu0 %v1500_v26  ;;  %v639_v26 = vld [vmem:[%s2585_s7 + $0x50] sm:$0xff] }
  0x42   :  { %1529 = vmatprep.subr.bf16.mxu0 %v1681_v50 }
  0x44   :  { %368 = vmatmul.mubr.f32.vlgmr.msra.gmra.mrb[2].mxu0 %v51_v27  ;;  %v640_v27 = vld [vmem:[%s2585_s7 + $0x58] sm:$0xff] }
  0x45   :  { %1368 = vmatprep.mubr.msk.f32.mxu0 %vm1682_vm0, %v1683_v60  ;;  %1531 = vmatpush3.bf16.msra.mxu0 %v1530_v15  ;;  %v1545_v28 = vpack.c.bf16 %v640_v27, %v639_v26  ;;  %v827_v15 = vld [vmem:[%s2588_s11 + $0x48] sm:$0xff]  ;;  %v837_v27 = vld [vmem:[%s2588_s11 + $0x98] sm:$0xff] }
  0x46   :  { %1532 = vmatprep.subr.bf16.mxu0 %v1681_v50  ;;  %v835_v26 = vld [vmem:[%s2588_s11 + $0x88] sm:$0xff] }
  0x47   :  { %v1593_v29 = vpack.c.bf16 %v837_v27, %v835_v26 }
  0x49   :  { %1534 = vmatpush3.bf16.msra.mxu0 %v1533_v17  ;;  %v1583_v17 = vpack.c.bf16 %v824_v14, %v822_v13  ;;  %v869_v13 = vld [vmem:[%s2588_s11 + $0x198] sm:$0xff] }
  0x4a   :  { %1535 = vmatprep.subr.bf16.mxu0 %v1681_v50 }
  0xf7   :  { %v1128_v40 = vpop.f32.mrb[0].mxu0 }
  0xf8   :  { %v1129_v42 = vpop.f32.mrb[1].mxu0 }
  0xf9   :  { %v1163_v43 = vpop.f32.mrb[0].mxu1  ;;  %v1130_v44 = vadd.f32 %v1129_v42, %v1128_v40  ;;  %v1092_v40 = vld [vmem:[%s2586_s6] ss:$0 sm:$0xff] }
  0xfa   :  { %v1164_v45 = vpop.f32.mrb[1].mxu1 }
  0xfb   :  { %v1165_v46 = vadd.f32 %v1164_v45, %v1163_v43  ;;  %v230_v47 = vadd.f32 %v1130_v44, %v1088_v41  ;;  %v1557_v41 = vpack.c.bf16 %v726_v39, %v725_v37  ;;  %v727_v43 = vld [vmem:[%s2587_s9 + $0x20] sm:$0xff]  ;;  %v728_v44 = vld [vmem:[%s2587_s9 + $0x28] sm:$0xff]  ;;  %v840_v37 = vld [vmem:[%s2588_s11 + $0xb0] sm:$0xff] }
  0xfc   :  { %v845_v39 = vld [vmem:[%s2588_s11 + $0xd8] sm:$0xff] }
  0xfd   :  { %v300_v48 = vadd.f32 %v1165_v46, %v230_v47  ;;  %v439_v49 = vpop.f32.mrb[2].mxu1 }
  0xfe   :  { %v1297_v51 = vpop.f32.mrb[3].mxu1 }
  0xff   :  { %v730_v51 = vld [vmem:[%s2587_s9 + $0x38] sm:$0xff] }
 0x117   :  { %v1198_v52 = vpop.f32.mrb[2].mxu0 }
 0x118   :  { %v1199_v53 = vpop.f32.mrb[3].mxu0 }
 0x119   :  { %v1200_v54 = vadd.f32 %v1199_v53, %v1198_v52 }
 0x11b   :  { %v370_v55 = vadd.f32 %v1200_v54, %v300_v48  ;;  %v1560_v48 = vpack.c.bf16 %v728_v44, %v727_v43  ;;  %v731_v54 = vld [vmem:[%s2587_s9 + $0x40] sm:$0xff]  ;;  %v844_v43 = vld [vmem:[%s2588_s11 + $0xd0] sm:$0xff]  ;;  %v847_v44 = vld [vmem:[%s2588_s11 + $0xe8] sm:$0xff] }
 0x11d   :  { %v440_v58 = vadd.f32 %v439_v49, %v370_v55  ;;  %v729_v49 = vld [vmem:[%s2587_s9 + $0x30] sm:$0xff]  ;;  %v732_v55 = vld [vmem:[%s2587_s9 + $0x48] sm:$0xff] }
 0x11e   :  { %v1563_v53 = vpack.c.bf16 %v730_v51, %v729_v49  ;;  %v1566_v56 = vpack.c.bf16 %v732_v55, %v731_v54  ;;  %v848_v49 = vld [vmem:[%s2588_s11 + $0xf0] sm:$0xff]  ;;  %v851_v51 = vld [vmem:[%s2588_s11 + $0x108] sm:$0xff]  ;;  %v850_v55 = vld [vmem:[%s2588_s11 + $0x100] sm:$0xff] }
 0x11f   :  { %v2121_v61 = vmax.f32 %v440_v58, 0.0  ;;  %v734_v58 = vld [vmem:[%s2587_s9 + $0x58] sm:$0xff] }
 0x121   :  { %1315 = vmatmul.mubr.msk.f32.vlgmr.msra.gmra.mrb[4].mxu1 %vm459_vm2, %v2121_v61 }
 0x122   :  { %1519 = vmatpush3.bf16.msra.mxu1 %v1518_v59  ;;  %1333 = vmatprep.mubr.msk.f32.mxu1 %vm1682_vm0, %v1683_v60  ;;  %v1569_v59 = vpack.c.bf16 %v734_v58, %v733_v57  ;;  %v855_v57 = vld [vmem:[%s2588_s11 + $0x128] sm:$0xff]  ;;  %v857_v58 = vld [vmem:[%s2588_s11 + $0x138] sm:$0xff] }
 0x123   :  { %1520 = vmatprep.subr.bf16.mxu1 %v1681_v50 }
 0x126   :  { %1522 = vmatpush3.bf16.msra.mxu1 %v1521_v0  ;;  %v1572_v0 = vpack.c.bf16 %v736_v63, %v735_v62  ;;  %v1613_v62 = vpack.c.bf16 %v857_v58, %v855_v57  ;;  %v854_v63 = vld [vmem:[%s2588_s11 + $0x120] sm:$0xff]  ;;  %v972_v58 = vld [vmem:[%s2590_s13 + $0x28] sm:$0xff] }
 0x127   :  { %1523 = vmatprep.subr.bf16.mxu1 %v1681_v50  ;;  %v971_v57 = vld [vmem:[%s2590_s13 + $0x20] sm:$0xff] }
 0x12a   :  { %1525 = vmatpush3.bf16.msra.mxu1 %v1524_v3  ;;  %v737_v3 = vld [vmem:[%s2587_s9 + $0x70] sm:$0xff] }
 0x12b   :  { %1526 = vmatprep.subr.bf16.mxu1 %v1681_v50  ;;  %v1575_v5 = vpack.c.bf16 %v738_v4, %v737_v3  ;;  %v861_v3 = vld [vmem:[%s2588_s11 + $0x158] sm:$0xff] }
 0x12e   :  { %1528 = vmatpush3.bf16.msra.mxu1 %v1527_v6  ;;  %v818_v6 = vld [vmem:[%s2588_s11] sm:$0xff] }
 0x12f   :  { %1553 = vmatprep.subr.bf16.mxu1 %v1681_v50 }
 0x1f4   :  { %v529_v8 = vpop.f32.mrb[4].mxu1 }
 0x1f5   :  { %v530_v9 = vadd.f32 %v1090_v7, %v529_v8  ;;  %v1316_v10 = vpop.f32.mrb[5].mxu1  ;;  %v820_v8 = vld [vmem:[%s2588_s11 + $0x10] sm:$0xff] }
 0x1f6   :  { %v825_v10 = vld [vmem:[%s2588_s11 + $0x38] sm:$0xff] }
 0x1f7   :  { %v533_v11 = vmax.f32 %v530_v9, 0.0  ;;  %v823_v9 = vld [vmem:[%s2588_s11 + $0x28] sm:$0xff] }
 0x1f8   :  { %v1581_v12 = vpack.c.bf16 %v825_v10, %v823_v9  ;;  %v862_v10 = vld [vmem:[%s2588_s11 + $0x160] sm:$0xff] }
 0x1f9   :  { %1334 = vmatmul.mubr.msk.f32.vlgmr.msra.gmra.mrb[6].mxu1 %vm459_vm2, %v533_v11  ;;  %v1579_v11 = vpack.c.bf16 %v820_v8, %v818_v6  ;;  %v863_v6 = vld [vmem:[%s2588_s11 + $0x168] sm:$0xff] }
 0x1fa   :  { %1403 = vmatprep.mubr.msk.f32.mxu1 %vm1682_vm0, %v1683_v60  ;;  %v633_v60 = vld [vmem:[%s2585_s7 + $0x20] sm:$0xff]  ;;  %1555 = vmatpush3.bf16.msra.mxu1 %v1554_v38  ;;  %v843_v38 = vld [vmem:[%s2588_s11 + $0xc8] sm:$0xff] }
 0x1fb   :  { %v1536_v19 = vpack.c.bf16 %v634_v18, %v633_v60  ;;  %1556 = vmatprep.subr.bf16.mxu1 %v1681_v50  ;;  %v1585_v60 = vpack.c.bf16 %v829_v16, %v827_v15  ;;  %v826_v18 = vld [vmem:[%s2588_s11 + $0x40] sm:$0xff] }
 0x1fc   :  { %v866_v16 = vld [vmem:[%s2588_s11 + $0x180] sm:$0xff] }
 0x1fd   :  { %1537 = vmatpush3.bf16.msra.mxu0 %v1536_v19  ;;  %v828_v19 = vld [vmem:[%s2588_s11 + $0x50] sm:$0xff] }
 0x1fe   :  { %1538 = vmatprep.subr.bf16.mxu0 %v1681_v50  ;;  %1558 = vmatpush3.bf16.msra.mxu1 %v1557_v41  ;;  %v1601_v41 = vpack.c.bf16 %v845_v39, %v843_v38  ;;  %v878_v38 = vld [vmem:[%s2588_s11 + $0x1e0] sm:$0xff]  ;;  %v880_v39 = vld [vmem:[%s2588_s11 + $0x1f0] sm:$0xff] }
 0x1ff   :  { %1559 = vmatprep.subr.bf16.mxu1 %v1681_v50 }
 0x201   :  { %1540 = vmatpush3.bf16.msra.mxu0 %v1539_v22  ;;  %v1587_v22 = vpack.c.bf16 %v828_v19, %v826_v18  ;;  %v873_v18 = vld [vmem:[%s2588_s11 + $0x1b8] sm:$0xff] }
 0x202   :  { %1541 = vmatprep.subr.bf16.mxu0 %v1681_v50  ;;  %1561 = vmatpush3.bf16.msra.mxu1 %v1560_v48  ;;  %v846_v48 = vld [vmem:[%s2588_s11 + $0xe0] sm:$0xff] }
 0x203   :  { %1562 = vmatprep.subr.bf16.mxu1 %v1681_v50 }
 0x205   :  { %1543 = vmatpush3.bf16.msra.mxu0 %v1542_v25  ;;  %v832_v25 = vld [vmem:[%s2588_s11 + $0x70] sm:$0xff] }
 0x206   :  { %1544 = vmatprep.subr.bf16.mxu0 %v1681_v50  ;;  %1564 = vmatpush3.bf16.msra.mxu1 %v1563_v53  ;;  %v1607_v53 = vpack.c.bf16 %v848_v49, %v846_v48 }
 0x207   :  { %1565 = vmatprep.subr.bf16.mxu1 %v1681_v50 }
 0x209   :  { %1546 = vmatpush3.bf16.msra.mxu0 %v1545_v28  ;;  %v1591_v28 = vpack.c.bf16 %v832_v25, %v830_v24  ;;  %v1094_v24 = vld [vmem:[%s2589_s8] ss:$0 sm:$0xff] }
 0x20a   :  { %1547 = vmatprep.subr.bf16.mxu0 %v1681_v50  ;;  %1567 = vmatpush3.bf16.msra.mxu1 %v1566_v56  ;;  %v852_v56 = vld [vmem:[%s2588_s11 + $0x110] sm:$0xff] }
 0x20b   :  { %1568 = vmatprep.subr.bf16.mxu1 %v1681_v50 }
 0x20d   :  { %1549 = vmatpush3.bf16.msra.mxu0 %v1548_v31  ;;  %v836_v31 = vld [vmem:[%s2588_s11 + $0x90] sm:$0xff] }
 0x20e   :  { %1550 = vmatprep.subr.bf16.mxu0 %v1681_v50  ;;  %1570 = vmatpush3.bf16.msra.mxu1 %v1569_v59  ;;  %v1611_v59 = vpack.c.bf16 %v852_v56, %v850_v55 }
 0x20f   :  { %1571 = vmatprep.subr.bf16.mxu1 %v1681_v50 }
 0x211   :  { %1552 = vmatpush3.bf16.msra.mxu0 %v1551_v34  ;;  %v1595_v34 = vpack.c.bf16 %v836_v31, %v834_v30  ;;  %v877_v30 = vld [vmem:[%s2588_s11 + $0x1d8] sm:$0xff] }
 0x212   :  { %1573 = vmatpush3.bf16.msra.mxu1 %v1572_v0  ;;  %v856_v0 = vld [vmem:[%s2588_s11 + $0x130] sm:$0xff] }
 0x213   :  { %1574 = vmatprep.subr.bf16.mxu1 %v1681_v50  ;;  %v819_v50 = vld [vmem:[%s2588_s11 + $0x8] sm:$0xff]  ;;  %v1615_v4 = vpack.c.bf16 %v856_v0, %v854_v63  ;;  %v1651_v63 = vpack.c.bf16 %v972_v58, %v971_v57 }
 0x216   :  { %1576 = vmatpush3.bf16.msra.mxu1 %v1575_v5 }
 0x2cc   :  { %v618_v42 = vpop.f32.mrb[6].mxu1 }
 0x2cd   :  { %v619_v45 = vadd.f32 %v1092_v40, %v618_v42  ;;  %v1335_v46 = vpop.f32.mrb[7].mxu1  ;;  %v1599_v40 = vpack.c.bf16 %v840_v37, %v838_v36  ;;  %v842_v42 = vld [vmem:[%s2588_s11 + $0xc0] sm:$0xff]  ;;  %v881_v36 = vld [vmem:[%s2588_s11 + $0x1f8] sm:$0xff] }
 0x2ce   :  { %v1603_v46 = vpack.c.bf16 %v844_v43, %v842_v42  ;;  %v984_v42 = vld [vmem:[%s2590_s13 + $0x88] sm:$0xff]  ;;  %v967_v43 = vld [vmem:[%s2590_s13] sm:$0xff] }
 0x2cf   :  { %v622_v47 = vmax.f32 %v619_v45, 0.0  ;;  %v849_v45 = vld [vmem:[%s2588_s11 + $0xf8] sm:$0xff] }
 0x2d1   :  { %v623_v52 = vadd.f32 %v622_v47, %v2121_v61  ;;  %v1605_v47 = vpack.c.bf16 %v849_v45, %v847_v44  ;;  %v968_v45 = vld [vmem:[%s2590_s13 + $0x8] sm:$0xff] }
 0x2d2   :  { %v1643_v48 = vpack.c.bf16 %v968_v45, %v967_v43 }
 0x2d3   :  { %625 = vrot.lane.b32.xlu0 %v623_v52, %s1684_s15  ;;  %v853_v52 = vld [vmem:[%s2588_s11 + $0x118] sm:$0xff] }
 0x2d4   :  { %v1609_v54 = vpack.c.bf16 %v853_v52, %v851_v51  ;;  %v969_v51 = vld [vmem:[%s2590_s13 + $0x10] sm:$0xff]  ;;  %v970_v52 = vld [vmem:[%s2590_s13 + $0x18] sm:$0xff] }
 0x2d5   :  { %v1647_v55 = vpack.c.bf16 %v970_v52, %v969_v51 }
 0x345   :  { %v626_v1 = vpop.permute.xlu0 %625 }
 0x346   :  { %v2265_v2 = vsel %vm459_vm2, %v2121_v61, %v626_v1  ;;  %v821_v61 = vld [vmem:[%s2588_s11 + $0x18] sm:$0xff]  ;;  %v859_v1 = vld [vmem:[%s2588_s11 + $0x148] sm:$0xff] }
 0x347   :  { %1369 = vmatmul.mubr.f32.vlgmr.msra.gmra.mrb[4].mxu0 %v2265_v2  ;;  %v1577_v7 = vpack.c.bf16 %v821_v61, %v819_v50  ;;  %v1617_v5 = vpack.c.bf16 %v861_v3, %v859_v1  ;;  %v858_v50 = vld [vmem:[%s2588_s11 + $0x140] sm:$0xff]  ;;  %v860_v61 = vld [vmem:[%s2588_s11 + $0x150] sm:$0xff]  ;;  %v974_v3 = vld [vmem:[%s2590_s13 + $0x38] sm:$0xff] }
 0x348   :  { %v1619_v8 = vpack.c.bf16 %v860_v61, %v858_v50  ;;  %v973_v1 = vld [vmem:[%s2590_s13 + $0x30] sm:$0xff] }
 0x349   :  { %1578 = vmatprep.subr.bf16.mxu0 %v1577_v7  ;;  %v865_v7 = vld [vmem:[%s2588_s11 + $0x178] sm:$0xff]  ;;  %v1655_v50 = vpack.c.bf16 %v974_v3, %v973_v1 }
 0x34a   :  { %1580 = vmatpush1.bf16.msra.mxu0 %v1579_v11  ;;  %v1621_v9 = vpack.c.bf16 %v865_v7, %v863_v6  ;;  %v864_v11 = vld [vmem:[%s2588_s11 + $0x170] sm:$0xff]  ;;  %v975_v6 = vld [vmem:[%s2590_s13 + $0x40] sm:$0xff]  ;;  %v976_v7 = vld [vmem:[%s2590_s13 + $0x48] sm:$0xff] }
 0x34b   :  { %1582 = vmatprep.subr.bf16.mxu0 %v1581_v12  ;;  %v867_v12 = vld [vmem:[%s2588_s11 + $0x188] sm:$0xff]  ;;  %v1623_v14 = vpack.c.bf16 %v864_v11, %v862_v10  ;;  %v1659_v10 = vpack.c.bf16 %v976_v7, %v975_v6 }
 0x34c   :  { %v1625_v15 = vpack.c.bf16 %v869_v13, %v867_v12  ;;  %v977_v12 = vld [vmem:[%s2590_s13 + $0x50] sm:$0xff]  ;;  %v978_v13 = vld [vmem:[%s2590_s13 + $0x58] sm:$0xff] }
 0x34e   :  { %1584 = vmatpush1.bf16.msra.mxu0 %v1583_v17  ;;  %v868_v17 = vld [vmem:[%s2588_s11 + $0x190] sm:$0xff] }
 0x34f   :  { %1586 = vmatprep.subr.bf16.mxu0 %v1585_v60  ;;  %v871_v60 = vld [vmem:[%s2588_s11 + $0x1a8] sm:$0xff]  ;;  %v1627_v19 = vpack.c.bf16 %v868_v17, %v866_v16  ;;  %v1663_v16 = vpack.c.bf16 %v978_v13, %v977_v12 }
 0x350   :  { %v1629_v20 = vpack.c.bf16 %v873_v18, %v871_v60  ;;  %v1095_v60 = vld [vmem:[%s2591_s10] ss:$0 sm:$0xff] }
 0x352   :  { %1588 = vmatpush1.bf16.msra.mxu0 %v1587_v22  ;;  %v872_v22 = vld [vmem:[%s2588_s11 + $0x1b0] sm:$0xff] }
 0x353   :  { %1590 = vmatprep.subr.bf16.mxu0 %v1589_v23  ;;  %v1631_v23 = vpack.c.bf16 %v872_v22, %v870_v21 }
 0x356   :  { %1592 = vmatpush1.bf16.msra.mxu0 %v1591_v28 }
 0x357   :  { %1594 = vmatprep.subr.bf16.mxu0 %v1593_v29  ;;  %v875_v29 = vld [vmem:[%s2588_s11 + $0x1c8] sm:$0xff] }
 0x358   :  { %v1633_v31 = vpack.c.bf16 %v877_v30, %v875_v29  ;;  %v982_v29 = vld [vmem:[%s2590_s13 + $0x78] sm:$0xff] }
 0x35a   :  { %1596 = vmatpush1.bf16.msra.mxu0 %v1595_v34  ;;  %v1635_v34 = vpack.c.bf16 %v876_v33, %v874_v32 }
 0x35b   :  { %1598 = vmatprep.subr.bf16.mxu0 %v1597_v35  ;;  %v879_v35 = vld [vmem:[%s2588_s11 + $0x1e8] sm:$0xff] }
 0x35c   :  { %v1637_v37 = vpack.c.bf16 %v881_v36, %v879_v35 }
 0x35e   :  { %1600 = vmatpush1.bf16.msra.mxu0 %v1599_v40  ;;  %v1639_v40 = vpack.c.bf16 %v880_v39, %v878_v38 }
 0x35f   :  { %1602 = vmatprep.subr.bf16.mxu0 %v1601_v41  ;;  %v983_v41 = vld [vmem:[%s2590_s13 + $0x80] sm:$0xff] }
 0x360   :  { %v1641_v44 = vpack.c.bf16 %v984_v42, %v983_v41 }
 0x362   :  { %1604 = vmatpush1.bf16.msra.mxu0 %v1603_v46  ;;  %v985_v46 = vld [vmem:[%s2590_s13 + $0x90] sm:$0xff]  ;;  %1642 = vmatprep.subr.bf16.mxu1 %v1641_v44 }
 0x363   :  { %1606 = vmatprep.subr.bf16.mxu0 %v1605_v47  ;;  %v986_v47 = vld [vmem:[%s2590_s13 + $0x98] sm:$0xff] }
 0x364   :  { %v1645_v49 = vpack.c.bf16 %v986_v47, %v985_v46 }
 0x366   :  { %1608 = vmatpush1.bf16.msra.mxu0 %v1607_v53  ;;  %v987_v53 = vld [vmem:[%s2590_s13 + $0xa0] sm:$0xff] }
 0x367   :  { %1610 = vmatprep.subr.bf16.mxu0 %v1609_v54  ;;  %v988_v54 = vld [vmem:[%s2590_s13 + $0xa8] sm:$0xff] }
 0x368   :  { %v1649_v56 = vpack.c.bf16 %v988_v54, %v987_v53 }
 0x36a   :  { %1612 = vmatpush1.bf16.msra.mxu0 %v1611_v59  ;;  %v989_v59 = vld [vmem:[%s2590_s13 + $0xb0] sm:$0xff] }
 0x36b   :  { %1614 = vmatprep.subr.bf16.mxu0 %v1613_v62  ;;  %v990_v62 = vld [vmem:[%s2590_s13 + $0xb8] sm:$0xff] }
 0x36c   :  { %v1653_v0 = vpack.c.bf16 %v990_v62, %v989_v59 }
 0x36e   :  { %1616 = vmatpush1.bf16.msra.mxu0 %v1615_v4  ;;  %v991_v4 = vld [vmem:[%s2590_s13 + $0xc0] sm:$0xff] }
 0x36f   :  { %1618 = vmatprep.subr.bf16.mxu0 %v1617_v5  ;;  %v992_v5 = vld [vmem:[%s2590_s13 + $0xc8] sm:$0xff] }
 0x370   :  { %v1657_v61 = vpack.c.bf16 %v992_v5, %v991_v4 }
 0x372   :  { %1620 = vmatpush1.bf16.msra.mxu0 %v1619_v8  ;;  %v993_v8 = vld [vmem:[%s2590_s13 + $0xd0] sm:$0xff] }
 0x373   :  { %1622 = vmatprep.subr.bf16.mxu0 %v1621_v9  ;;  %v994_v9 = vld [vmem:[%s2590_s13 + $0xd8] sm:$0xff] }
 0x374   :  { %v1661_v11 = vpack.c.bf16 %v994_v9, %v993_v8 }
 0x376   :  { %1624 = vmatpush1.bf16.msra.mxu0 %v1623_v14  ;;  %v995_v14 = vld [vmem:[%s2590_s13 + $0xe0] sm:$0xff] }
 0x377   :  { %1626 = vmatprep.subr.bf16.mxu0 %v1625_v15  ;;  %v996_v15 = vld [vmem:[%s2590_s13 + $0xe8] sm:$0xff] }
 0x378   :  { %v1665_v17 = vpack.c.bf16 %v996_v15, %v995_v14 }
 0x37a   :  { %1628 = vmatpush1.bf16.msra.mxu0 %v1627_v19 }
 0x37b   :  { %1630 = vmatprep.subr.bf16.mxu0 %v1629_v20 }
 0x37e   :  { %1632 = vmatpush1.bf16.msra.mxu0 %v1631_v23  ;;  %v979_v23 = vld [vmem:[%s2590_s13 + $0x60] sm:$0xff] }
 0x37f   :  { %1634 = vmatprep.subr.bf16.mxu0 %v1633_v31  ;;  %v884_v31 = vlaneseq }
 0x381   :  { %v885_v32 = vshrl.u32 %v884_v31, 7 }
 0x382   :  { %1636 = vmatpush1.bf16.msra.mxu0 %v1635_v34  ;;  %v882_v34 = vld [vmem:[%s2592_s12] sm:$0x3] }
 0x383   :  { %1638 = vmatprep.subr.bf16.mxu0 %v1637_v37  ;;  %v886_v33 = vsub.s32 0, %v885_v32  ;;  %v890_v35 = vsub.s32 1, %v885_v32 }
 0x385   :  { %v887_v36 = vrot.slane %v882_v34, %v886_v33  ;;  %v891_v37 = vrot.slane %v882_v34, %v890_v35 }
 0x386   :  { %1640 = vmatpush1.bf16.msra.mxu0 %v1639_v40 }
 0x41a   :  { %v718_v25 = vpop.f32.mrb[4].mxu0 }
 0x41b   :  { %v719_v26 = vadd.f32 %v1094_v24, %v718_v25  ;;  %v1370_v27 = vpop.f32.mrb[5].mxu0  ;;  %v980_v24 = vld [vmem:[%s2590_s13 + $0x68] sm:$0xff] }
 0x41c   :  { %v1667_v25 = vpack.c.bf16 %v980_v24, %v979_v23  ;;  %v998_v27 = vld [vmem:[%s2590_s13 + $0xf8] sm:$0xff] }
 0x41d   :  { %v722_v28 = vmax.f32 %v719_v26, 0.0  ;;  %v997_v26 = vld [vmem:[%s2590_s13 + $0xf0] sm:$0xff] }
 0x41f   :  { %1404 = vmatmul.mubr.f32.vlgmr.msra.gmra.mrb[8].mxu1 %v722_v28  ;;  %v1669_v28 = vpack.c.bf16 %v998_v27, %v997_v26 }
 0x420   :  { %1644 = vmatpush3.bf16.msra.mxu1 %v1643_v48 }
 0x421   :  { %1646 = vmatprep.subr.bf16.mxu1 %v1645_v49 }
 0x424   :  { %1648 = vmatpush3.bf16.msra.mxu1 %v1647_v55 }
 0x425   :  { %1650 = vmatprep.subr.bf16.mxu1 %v1649_v56 }
 0x428   :  { %1652 = vmatpush3.bf16.msra.mxu1 %v1651_v63 }
 0x429   :  { %1654 = vmatprep.subr.bf16.mxu1 %v1653_v0 }
 0x42c   :  { %1656 = vmatpush3.bf16.msra.mxu1 %v1655_v50 }
 0x42d   :  { %1658 = vmatprep.subr.bf16.mxu1 %v1657_v61 }
 0x430   :  { %1660 = vmatpush3.bf16.msra.mxu1 %v1659_v10 }
 0x431   :  { %1662 = vmatprep.subr.bf16.mxu1 %v1661_v11 }
 0x434   :  { %1664 = vmatpush3.bf16.msra.mxu1 %v1663_v16 }
 0x435   :  { %1666 = vmatprep.subr.bf16.mxu1 %v1665_v17 }
 0x438   :  { %1668 = vmatpush3.bf16.msra.mxu1 %v1667_v25 }
 0x439   :  { %1670 = vmatprep.subr.bf16.mxu1 %v1669_v28 }
 0x4f2   :  { %v812_v18 = vpop.f32.mrb[8].mxu1 }
 0x4f3   :  { %v813_v19 = vadd.f32 %v1095_v60, %v812_v18  ;;  %v1405_v20 = vpop.f32.mrb[9].mxu1 }
 0x4f5   :  { %v816_v21 = vmax.f32 %v813_v19, 0.0 }
 0x4f7   :  { %v817_v22 = vadd.f32 %v816_v21, %v2265_v2 }
 0x4f9   :  { %958 = vmatprep.mubr.f32.mxu0 %v817_v22 }
 0x4fa   :  { %959 = vmatmul.mubr.f32.vlgmr.msra.gmra.mrb[6].mxu0 %v2265_v2  ;;  %v981_v2 = vld [vmem:[%s2590_s13 + $0x70] sm:$0xff] }
 0x4fb   :  { %v1671_v30 = vpack.c.bf16 %v982_v29, %v981_v2 }
 0x4fd   :  { %1672 = vmatpush3.bf16.msra.mxu1 %v1671_v30 }
 0x5cd   :  { %v960_v38 = vpop.f32.mrb[6].mxu0 }
 0x5ce   :  { %v961_v39 = vadd.f32 %v960_v38, %v887_v36  ;;  %v962_v40 = vpop.f32.mrb[7].mxu0 }
 0x5cf   :  { %v963_v41 = vadd.f32 %v962_v40, %v891_v37 }
 0x5d0   :  { %v965_v43 = vmax.f32 %v961_v39, 0.0 }
 0x5d1   :  { %v966_v42 = vmax.f32 %v963_v41, 0.0 }
 0x5d3   :  { %1063 = vmatprep.mubr.f32.mxu1 %v966_v42 }
 0x5d4   :  { %1064 = vmatmul.mubr.f32.vlgmr.msra.gmra.mrb[10].mxu1 %v965_v43 }
 0x6a7   :  { %v1288_v44 = vpop.f32.mrb[10].mxu1 }
 0x6a8   :  { %v1289_v45 = vpop.f32.mrb[11].mxu1 }
 0x6a9   :  { %v1290_v46 = vadd.f32 %v1289_v45, %v1288_v44 }
 0x6ab   :  { %v1070_v47 = vsel %vm1069_vm3, %v1290_v46, -inf }
 0x6ac   :  { %1071 = vmax.xlane.f32.xlu0 %v1070_v47 }
 0x739   :  { %v1072_v48 = vpop.xlane.xlu0 %1071 }
 0x73a   :  { %v1073_v49 = vsub.f32 %v1290_v46, %v1072_v48 }
 0x73c   :  { %v1074_v51 = vmul.f32 1.442695, %v1073_v49 }
 0x73e   :  { %1677 = vpow2.f32 %v1074_v51 }
 0x748   :  { %v1678_v52 = vpop.eup %1677 }
 0x749   :  { %v1076_v53 = vsel %vm1069_vm3, %v1678_v52, 0.0 }
 0x74a   :  { %1077 = vadd.xlane.f32.xlu1 %v1076_v53 }
 0x7d7   :  { %v1078_v54 = vpop.xlane.xlu1 %1077 }
 0x7d8   :  { %1679 = vlog2.f32 %v1078_v54 }
 0x7e2   :  { %v1680_v55 = vpop.eup %1679 }
 0x7e3   :  { %v1080_v56 = vmul.f32 0.6931472, %v1680_v55 }
 0x7e5   :  { %v1081_v57 = vadd.f32 %v1080_v56, %v1072_v48 }
 0x7e7   :  { %v1082_v58 = vsub.f32 %v1290_v46, %v1081_v57 }
 0x7e9   :  { %1083 = vst.msk [vmem:[%s2593_s14] sm:$0xff] %vm1069_vm3, %v1082_v58 }

</bundles_post_ra>
